<compile_context>
chip_gen: v7x
topology: tpu7x:2x2x1
jax: 0.10.0
libtpu: 0.0.40
codegen_flags: <defaults>
</compile_context>

<pallas_src>
import jax
import jax.numpy as jnp
from jax.experimental import pallas as pl
from jax.experimental.pallas import tpu as pltpu

# ------------------------- model dimensions (small) -------------------------
B = 8            # batch (per view)
C = 3            # image channels (matches the 3-element std tuple)
H = W = 16       # spatial
FEAT = 128       # backbone feature_size
PROJ = 128       # projection_dim (= hidden_dim_proj)
PRED_H = 128     # hidden_dim_pred

BN_EPS = 1e-5    # nn.BatchNorm1d default
NORM_EPS = 1e-12 # F.normalize default

# weight-slab rows: [proj.l1 (backbone fused), proj.l2, proj.l3, pred.l1, pred.l2]
# vector-slab rows:
#   0-2:   proj.l1  fused-bias / gamma / beta
#   3-5:   proj.l2  bias / gamma / beta
#   6-8:   proj.l3  bias / gamma / beta
#   9-11:  pred.l1  bias / gamma / beta
#   12:    pred.l2  bias


# --------------------------------- kernel -----------------------------------
def simsiam_kernel(x_ref, w_ref, v_ref, loss_ref):
    def linear(x, wi, bi):
        # bf16 MXU operands, f32 accumulation; bias is a (1, D) sublane row so
        # the broadcast happens on the add path.
        return (jnp.dot(x.astype(jnp.bfloat16), w_ref[wi],
                        preferred_element_type=jnp.float32)
                + v_ref[bi:bi + 1, :])

    def batchnorm(y, gi, bi):
        # BatchNorm1d (training mode, biased variance) with PER-VIEW batch
        # statistics: the fused (2B, D) activation is viewed as (2, B, D) and
        # reduced over axis=1, matching two separate reference forward passes.
        # Epilogue is y*s + t with s/t computed on the tiny (2, 1, D) stats.
        d = y.shape[-1]
        yv = y.reshape(2, B, d)
        m = jnp.mean(yv, axis=1, keepdims=True)                  # (2, 1, d)
        ms = jnp.mean(yv * yv, axis=1, keepdims=True)            # (2, 1, d)
        var = jnp.maximum(ms - m * m, 0.0)
        s = v_ref[gi:gi + 1, :] * jax.lax.rsqrt(var + BN_EPS)    # (2, 1, d)
        t = v_ref[bi:bi + 1, :] - m * s                          # (2, 1, d)
        return (yv * s + t).reshape(2 * B, d)

    x = x_ref[...]                                   # (2B, FEAT), f32

    # projector (toy backbone linear is folded into layer1's weight/bias):
    # Linear+BN+ReLU / Linear+BN+ReLU / Linear+BN
    h = jnp.maximum(batchnorm(linear(x, 0, 0), 1, 2), 0.0)
    h = jnp.maximum(batchnorm(linear(h, 1, 3), 4, 5), 0.0)
    z = batchnorm(linear(h, 2, 6), 7, 8)             # no ReLU

    # predictor: Linear+BN+ReLU / Linear
    h = jnp.maximum(batchnorm(linear(z, 3, 9), 10, 11), 0.0)
    p = linear(h, 4, 12)

    # symmetric negative cosine similarity (z is "detached" in the reference;
    # the forward value is identical).  F.normalize's eps clamp is applied to
    # the squared norm so the divide/sqrt becomes a single EUP rsqrt:
    # v * rsqrt(max(|v|^2, eps^2)) == v / max(|v|, eps).
    eps2 = NORM_EPS * NORM_EPS
    pn = p * jax.lax.rsqrt(jnp.maximum(jnp.sum(p * p, axis=1, keepdims=True), eps2))
    zn = z * jax.lax.rsqrt(jnp.maximum(jnp.sum(z * z, axis=1, keepdims=True), eps2))
    d1 = jnp.sum(pn[:B] * zn[B:], axis=1, keepdims=True)   # p1 . z2  -> (B, 1)
    d2 = jnp.sum(pn[B:] * zn[:B], axis=1, keepdims=True)   # p2 . z1  -> (B, 1)
    loss_ref[...] = -0.5 * (jnp.mean(d1, axis=0, keepdims=True)
                            + jnp.mean(d2, axis=0, keepdims=True))


# ------------------------------- parameters ---------------------------------
def init_params(key):
    def lin(k, din, dout, scale=0.05):
        kw, _ = jax.random.split(k)
        w = jax.random.normal(kw, (din, dout), jnp.float32) * scale
        b = jnp.zeros((1, dout), jnp.float32)
        return w, b

    def bn(dout):
        return jnp.ones((1, dout), jnp.float32), jnp.zeros((1, dout), jnp.float32)

    keys = jax.random.split(key, 8)
    wb, bb = lin(keys[0], C, FEAT)                                  # toy backbone linear
    w1, b1 = lin(keys[1], FEAT, PROJ); g1, be1 = bn(PROJ)           # projector.layer1
    w2, b2 = lin(keys[2], PROJ, PROJ); g2, be2 = bn(PROJ)           # projector.layer2
    w3, b3 = lin(keys[3], PROJ, PROJ); g3, be3 = bn(PROJ)           # projector.layer3
    wp1, bp1 = lin(keys[4], PROJ, PRED_H); gp1, bep1 = bn(PRED_H)   # predictor.layer1
    wp2, bp2 = lin(keys[5], PRED_H, PROJ)                           # predictor.layer2
    return (wb, bb,
            w1, b1, g1, be1,
            w2, b2, g2, be2,
            w3, b3, g3, be3,
            wp1, bp1, gp1, bep1,
            wp2, bp2)


def pack_params(params):
    """Build the (5,128,128) bf16 weight slab and (13,128) f32 vector slab.

    Called ONCE (at init / whenever parameters change), NOT in the per-step
    path: the jitted loss consumes the packed slabs directly.
    """
    (wb, bb,
     w1, b1, g1, be1,
     w2, b2, g2, be2,
     w3, b3, g3, be3,
     wp1, bp1, gp1, bep1,
     wp2, bp2) = params

    # Fold Normalize(mean, std) into the backbone linear (both are affine and
    # commute with global average pooling):
    #   ((x - mean)/std) @ W + b  ==  x @ (W/std) + (b - (mean/std) @ W)
    mean = jnp.full((C,), 0.5, jnp.float32)
    std = jnp.array([0.229, 0.224, 0.225], jnp.float32)
    wb_fold = wb / std[:, None]                       # (C, FEAT)
    bb_fold = bb - (mean / std) @ wb                  # (1, FEAT)

    # Fuse the toy backbone linear into projector.layer1 (no nonlinearity in
    # between, so they compose exactly).  Pad the fused weight's contraction
    # rows to FEAT so the kernel input stays one 128-lane slab entry.
    w1_fused = wb_fold @ w1                           # (C, PROJ), f32
    b1_fused = bb_fold @ w1 + b1                      # (1, PROJ), f32
    w1_pad = jnp.zeros((FEAT, PROJ), jnp.float32).at[:C, :].set(w1_fused)

    w_slab = jnp.stack([w1_pad, w2, w3, wp1, wp2]).astype(jnp.bfloat16)  # (5,128,128)
    v_slab = jnp.concatenate(
        [b1_fused, g1, be1,
         b2, g2, be2,
         b3, g3, be3,
         bp1, gp1, bep1,
         bp2], axis=0).astype(jnp.float32)                               # (13,128)
    return w_slab, v_slab


# -------------------------------- wrapper ------------------------------------
@jax.jit
def simsiam_loss(x, w_slab, v_slab):
    # TODO(synk): torchvision random augmentations (RandomResizedCrop,
    # ColorJitter, RandomGrayscale, GaussianBlur, RandomHorizontalFlip) have no
    # clean Pallas equivalent; deterministic stand-in keeps both views equal to
    # the identity view.  Global mean pooling is flip-invariant, so the second
    # view's pooling pass is not recomputed; the fused (2B, D) activation keeps
    # both rows so the two-view forward structure (per-view BN stats, symmetric
    # loss) is preserved for when real augmentations are plugged in.
    x1p = jnp.mean(x, axis=(2, 3))                        # (B, C)
    xin = jnp.concatenate([x1p, x1p], axis=0)             # (2B, C) -- view2 == view1
    xin = jnp.pad(xin, ((0, 0), (0, FEAT - C)))           # (2B, FEAT), zero-padded lanes

    vmem = pl.BlockSpec(memory_space=pltpu.MemorySpace.VMEM)
    loss = pl.pallas_call(
        simsiam_kernel,
        out_shape=jax.ShapeDtypeStruct((1, 1), jnp.float32),
        in_specs=[vmem, vmem, vmem],
        out_specs=vmem,
    )(xin, w_slab, v_slab)
    return loss[0, 0]


if __name__ == "__main__":
    key = jax.random.PRNGKey(0)
    k_x, k_p = jax.random.split(key)
    x = jax.random.normal(k_x, (B, C, H, W), jnp.float32)

    params = init_params(k_p)
    # Pack once, outside the per-call path; slabs live on device and are reused.
    w_slab, v_slab = pack_params(params)
    jax.block_until_ready((w_slab, v_slab))

    loss = simsiam_loss(x, w_slab, v_slab)
    jax.block_until_ready(loss)
    assert loss.shape == () and jnp.isfinite(loss)
    print("KERNEL_OK")
</pallas_src>

<mosaic_0001>
module attributes {stable_mosaic.version = 11 : i64} {
  func.func @simsiam_kernel(%arg0: memref<16x128xf32, #tpu.memory_space<vmem>>, %arg1: memref<5x128x128xbf16, #tpu.memory_space<vmem>>, %arg2: memref<13x128xf32, #tpu.memory_space<vmem>>, %arg3: memref<1x1xf32, #tpu.memory_space<vmem>>) attributes {dimension_semantics = [], scalar_prefetch = 0 : i64, scratch_operands = 0 : i64, tpu.core_type = #tpu.core_type<tc>} {
    %c0 = arith.constant 0 : index
    %c0_0 = arith.constant 0 : index
    %0 = vector.load %arg0[%c0, %c0_0] : memref<16x128xf32, #tpu.memory_space<vmem>>, vector<16x128xf32>
    %1 = arith.truncf %0 : vector<16x128xf32> to vector<16x128xbf16>
    %c0_1 = arith.constant 0 : index
    %c0_2 = arith.constant 0 : index
    %c0_3 = arith.constant 0 : index
    %2 = vector.load %arg1[%c0_1, %c0_2, %c0_3] : memref<5x128x128xbf16, #tpu.memory_space<vmem>>, vector<1x128x128xbf16>
    %3 = vector.shape_cast %2 : vector<1x128x128xbf16> to vector<128x128xbf16>
    %cst = arith.constant dense<0.000000e+00> : vector<16x128xf32>
    %4 = tpu.matmul %1, %3, %cst {dimension_numbers = #tpu.dot_dimension_numbers<[1], [0], [0], [1], [0, 0, 1, 1], [], []>} : vector<16x128xbf16>, vector<128x128xbf16>, vector<16x128xf32> -> vector<16x128xf32>
    %c0_4 = arith.constant 0 : index
    %c0_5 = arith.constant 0 : index
    %5 = vector.load %arg2[%c0_4, %c0_5] : memref<13x128xf32, #tpu.memory_space<vmem>>, vector<1x128xf32>
    %6 = vector.broadcast %5 : vector<1x128xf32> to vector<16x128xf32>
    %7 = arith.addf %4, %6 : vector<16x128xf32>
    %8 = vector.shape_cast %7 : vector<16x128xf32> to vector<2x8x128xf32>
    %cst_6 = arith.constant dense<0.000000e+00> : vector<2x128xf32>
    %9 = vector.multi_reduction <add>, %8, %cst_6 [1] : vector<2x8x128xf32> to vector<2x128xf32>
    %10 = vector.shape_cast %9 : vector<2x128xf32> to vector<2x1x128xf32>
    %cst_7 = arith.constant 8.000000e+00 : f32
    %11 = vector.broadcast %cst_7 : f32 to vector<2x1x128xf32>
    %12 = arith.divf %10, %11 : vector<2x1x128xf32>
    %13 = arith.mulf %8, %8 : vector<2x8x128xf32>
    %cst_8 = arith.constant dense<0.000000e+00> : vector<2x128xf32>
    %14 = vector.multi_reduction <add>, %13, %cst_8 [1] : vector<2x8x128xf32> to vector<2x128xf32>
    %15 = vector.shape_cast %14 : vector<2x128xf32> to vector<2x1x128xf32>
    %cst_9 = arith.constant 8.000000e+00 : f32
    %16 = vector.broadcast %cst_9 : f32 to vector<2x1x128xf32>
    %17 = arith.divf %15, %16 : vector<2x1x128xf32>
    %18 = arith.mulf %12, %12 : vector<2x1x128xf32>
    %19 = arith.subf %17, %18 : vector<2x1x128xf32>
    %cst_10 = arith.constant 0.000000e+00 : f32
    %20 = vector.broadcast %cst_10 : f32 to vector<2x1x128xf32>
    %21 = arith.maximumf %19, %20 : vector<2x1x128xf32>
    %c1 = arith.constant 1 : index
    %c0_11 = arith.constant 0 : index
    %22 = vector.load %arg2[%c1, %c0_11] : memref<13x128xf32, #tpu.memory_space<vmem>>, vector<1x128xf32>
    %cst_12 = arith.constant 9.99999974E-6 : f32
    %23 = vector.broadcast %cst_12 : f32 to vector<2x1x128xf32>
    %24 = arith.addf %21, %23 : vector<2x1x128xf32>
    %25 = math.rsqrt %24 : vector<2x1x128xf32>
    %26 = vector.shape_cast %22 : vector<1x128xf32> to vector<1x1x128xf32>
    %27 = vector.broadcast %26 : vector<1x1x128xf32> to vector<2x1x128xf32>
    %28 = arith.mulf %27, %25 : vector<2x1x128xf32>
    %c2 = arith.constant 2 : index
    %c0_13 = arith.constant 0 : index
    %29 = vector.load %arg2[%c2, %c0_13] : memref<13x128xf32, #tpu.memory_space<vmem>>, vector<1x128xf32>
    %30 = arith.mulf %12, %28 : vector<2x1x128xf32>
    %31 = vector.shape_cast %29 : vector<1x128xf32> to vector<1x1x128xf32>
    %32 = vector.broadcast %31 : vector<1x1x128xf32> to vector<2x1x128xf32>
    %33 = arith.subf %32, %30 : vector<2x1x128xf32>
    %34 = vector.broadcast %28 : vector<2x1x128xf32> to vector<2x8x128xf32>
    %35 = arith.mulf %8, %34 : vector<2x8x128xf32>
    %36 = vector.broadcast %33 : vector<2x1x128xf32> to vector<2x8x128xf32>
    %37 = arith.addf %35, %36 : vector<2x8x128xf32>
    %38 = vector.shape_cast %37 : vector<2x8x128xf32> to vector<16x128xf32>
    %cst_14 = arith.constant 0.000000e+00 : f32
    %39 = vector.broadcast %cst_14 : f32 to vector<16x128xf32>
    %40 = arith.maximumf %38, %39 : vector<16x128xf32>
    %41 = arith.truncf %40 : vector<16x128xf32> to vector<16x128xbf16>
    %c1_15 = arith.constant 1 : index
    %c0_16 = arith.constant 0 : index
    %c0_17 = arith.constant 0 : index
    %42 = vector.load %arg1[%c1_15, %c0_16, %c0_17] : memref<5x128x128xbf16, #tpu.memory_space<vmem>>, vector<1x128x128xbf16>
    %43 = vector.shape_cast %42 : vector<1x128x128xbf16> to vector<128x128xbf16>
    %cst_18 = arith.constant dense<0.000000e+00> : vector<16x128xf32>
    %44 = tpu.matmul %41, %43, %cst_18 {dimension_numbers = #tpu.dot_dimension_numbers<[1], [0], [0], [1], [0, 0, 1, 1], [], []>} : vector<16x128xbf16>, vector<128x128xbf16>, vector<16x128xf32> -> vector<16x128xf32>
    %c3 = arith.constant 3 : index
    %c0_19 = arith.constant 0 : index
    %45 = vector.load %arg2[%c3, %c0_19] : memref<13x128xf32, #tpu.memory_space<vmem>>, vector<1x128xf32>
    %46 = vector.broadcast %45 : vector<1x128xf32> to vector<16x128xf32>
    %47 = arith.addf %44, %46 : vector<16x128xf32>
    %48 = vector.shape_cast %47 : vector<16x128xf32> to vector<2x8x128xf32>
    %cst_20 = arith.constant dense<0.000000e+00> : vector<2x128xf32>
    %49 = vector.multi_reduction <add>, %48, %cst_20 [1] : vector<2x8x128xf32> to vector<2x128xf32>
    %50 = vector.shape_cast %49 : vector<2x128xf32> to vector<2x1x128xf32>
    %cst_21 = arith.constant 8.000000e+00 : f32
    %51 = vector.broadcast %cst_21 : f32 to vector<2x1x128xf32>
    %52 = arith.divf %50, %51 : vector<2x1x128xf32>
    %53 = arith.mulf %48, %48 : vector<2x8x128xf32>
    %cst_22 = arith.constant dense<0.000000e+00> : vector<2x128xf32>
    %54 = vector.multi_reduction <add>, %53, %cst_22 [1] : vector<2x8x128xf32> to vector<2x128xf32>
    %55 = vector.shape_cast %54 : vector<2x128xf32> to vector<2x1x128xf32>
    %cst_23 = arith.constant 8.000000e+00 : f32
    %56 = vector.broadcast %cst_23 : f32 to vector<2x1x128xf32>
    %57 = arith.divf %55, %56 : vector<2x1x128xf32>
    %58 = arith.mulf %52, %52 : vector<2x1x128xf32>
    %59 = arith.subf %57, %58 : vector<2x1x128xf32>
    %cst_24 = arith.constant 0.000000e+00 : f32
    %60 = vector.broadcast %cst_24 : f32 to vector<2x1x128xf32>
    %61 = arith.maximumf %59, %60 : vector<2x1x128xf32>
    %c4 = arith.constant 4 : index
    %c0_25 = arith.constant 0 : index
    %62 = vector.load %arg2[%c4, %c0_25] : memref<13x128xf32, #tpu.memory_space<vmem>>, vector<1x128xf32>
    %cst_26 = arith.constant 9.99999974E-6 : f32
    %63 = vector.broadcast %cst_26 : f32 to vector<2x1x128xf32>
    %64 = arith.addf %61, %63 : vector<2x1x128xf32>
    %65 = math.rsqrt %64 : vector<2x1x128xf32>
    %66 = vector.shape_cast %62 : vector<1x128xf32> to vector<1x1x128xf32>
    %67 = vector.broadcast %66 : vector<1x1x128xf32> to vector<2x1x128xf32>
    %68 = arith.mulf %67, %65 : vector<2x1x128xf32>
    %c5 = arith.constant 5 : index
    %c0_27 = arith.constant 0 : index
    %69 = vector.load %arg2[%c5, %c0_27] : memref<13x128xf32, #tpu.memory_space<vmem>>, vector<1x128xf32>
    %70 = arith.mulf %52, %68 : vector<2x1x128xf32>
    %71 = vector.shape_cast %69 : vector<1x128xf32> to vector<1x1x128xf32>
    %72 = vector.broadcast %71 : vector<1x1x128xf32> to vector<2x1x128xf32>
    %73 = arith.subf %72, %70 : vector<2x1x128xf32>
    %74 = vector.broadcast %68 : vector<2x1x128xf32> to vector<2x8x128xf32>
    %75 = arith.mulf %48, %74 : vector<2x8x128xf32>
    %76 = vector.broadcast %73 : vector<2x1x128xf32> to vector<2x8x128xf32>
    %77 = arith.addf %75, %76 : vector<2x8x128xf32>
    %78 = vector.shape_cast %77 : vector<2x8x128xf32> to vector<16x128xf32>
    %cst_28 = arith.constant 0.000000e+00 : f32
    %79 = vector.broadcast %cst_28 : f32 to vector<16x128xf32>
    %80 = arith.maximumf %78, %79 : vector<16x128xf32>
    %81 = arith.truncf %80 : vector<16x128xf32> to vector<16x128xbf16>
    %c2_29 = arith.constant 2 : index
    %c0_30 = arith.constant 0 : index
    %c0_31 = arith.constant 0 : index
    %82 = vector.load %arg1[%c2_29, %c0_30, %c0_31] : memref<5x128x128xbf16, #tpu.memory_space<vmem>>, vector<1x128x128xbf16>
    %83 = vector.shape_cast %82 : vector<1x128x128xbf16> to vector<128x128xbf16>
    %cst_32 = arith.constant dense<0.000000e+00> : vector<16x128xf32>
    %84 = tpu.matmul %81, %83, %cst_32 {dimension_numbers = #tpu.dot_dimension_numbers<[1], [0], [0], [1], [0, 0, 1, 1], [], []>} : vector<16x128xbf16>, vector<128x128xbf16>, vector<16x128xf32> -> vector<16x128xf32>
    %c6 = arith.constant 6 : index
    %c0_33 = arith.constant 0 : index
    %85 = vector.load %arg2[%c6, %c0_33] : memref<13x128xf32, #tpu.memory_space<vmem>>, vector<1x128xf32>
    %86 = vector.broadcast %85 : vector<1x128xf32> to vector<16x128xf32>
    %87 = arith.addf %84, %86 : vector<16x128xf32>
    %88 = vector.shape_cast %87 : vector<16x128xf32> to vector<2x8x128xf32>
    %cst_34 = arith.constant dense<0.000000e+00> : vector<2x128xf32>
    %89 = vector.multi_reduction <add>, %88, %cst_34 [1] : vector<2x8x128xf32> to vector<2x128xf32>
    %90 = vector.shape_cast %89 : vector<2x128xf32> to vector<2x1x128xf32>
    %cst_35 = arith.constant 8.000000e+00 : f32
    %91 = vector.broadcast %cst_35 : f32 to vector<2x1x128xf32>
    %92 = arith.divf %90, %91 : vector<2x1x128xf32>
    %93 = arith.mulf %88, %88 : vector<2x8x128xf32>
    %cst_36 = arith.constant dense<0.000000e+00> : vector<2x128xf32>
    %94 = vector.multi_reduction <add>, %93, %cst_36 [1] : vector<2x8x128xf32> to vector<2x128xf32>
    %95 = vector.shape_cast %94 : vector<2x128xf32> to vector<2x1x128xf32>
    %cst_37 = arith.constant 8.000000e+00 : f32
    %96 = vector.broadcast %cst_37 : f32 to vector<2x1x128xf32>
    %97 = arith.divf %95, %96 : vector<2x1x128xf32>
    %98 = arith.mulf %92, %92 : vector<2x1x128xf32>
    %99 = arith.subf %97, %98 : vector<2x1x128xf32>
    %cst_38 = arith.constant 0.000000e+00 : f32
    %100 = vector.broadcast %cst_38 : f32 to vector<2x1x128xf32>
    %101 = arith.maximumf %99, %100 : vector<2x1x128xf32>
    %c7 = arith.constant 7 : index
    %c0_39 = arith.constant 0 : index
    %102 = vector.load %arg2[%c7, %c0_39] : memref<13x128xf32, #tpu.memory_space<vmem>>, vector<1x128xf32>
    %cst_40 = arith.constant 9.99999974E-6 : f32
    %103 = vector.broadcast %cst_40 : f32 to vector<2x1x128xf32>
    %104 = arith.addf %101, %103 : vector<2x1x128xf32>
    %105 = math.rsqrt %104 : vector<2x1x128xf32>
    %106 = vector.shape_cast %102 : vector<1x128xf32> to vector<1x1x128xf32>
    %107 = vector.broadcast %106 : vector<1x1x128xf32> to vector<2x1x128xf32>
    %108 = arith.mulf %107, %105 : vector<2x1x128xf32>
    %c8 = arith.constant 8 : index
    %c0_41 = arith.constant 0 : index
    %109 = vector.load %arg2[%c8, %c0_41] : memref<13x128xf32, #tpu.memory_space<vmem>>, vector<1x128xf32>
    %110 = arith.mulf %92, %108 : vector<2x1x128xf32>
    %111 = vector.shape_cast %109 : vector<1x128xf32> to vector<1x1x128xf32>
    %112 = vector.broadcast %111 : vector<1x1x128xf32> to vector<2x1x128xf32>
    %113 = arith.subf %112, %110 : vector<2x1x128xf32>
    %114 = vector.broadcast %108 : vector<2x1x128xf32> to vector<2x8x128xf32>
    %115 = arith.mulf %88, %114 : vector<2x8x128xf32>
    %116 = vector.broadcast %113 : vector<2x1x128xf32> to vector<2x8x128xf32>
    %117 = arith.addf %115, %116 : vector<2x8x128xf32>
    %118 = vector.shape_cast %117 : vector<2x8x128xf32> to vector<16x128xf32>
    %119 = arith.truncf %118 : vector<16x128xf32> to vector<16x128xbf16>
    %c3_42 = arith.constant 3 : index
    %c0_43 = arith.constant 0 : index
    %c0_44 = arith.constant 0 : index
    %120 = vector.load %arg1[%c3_42, %c0_43, %c0_44] : memref<5x128x128xbf16, #tpu.memory_space<vmem>>, vector<1x128x128xbf16>
    %121 = vector.shape_cast %120 : vector<1x128x128xbf16> to vector<128x128xbf16>
    %cst_45 = arith.constant dense<0.000000e+00> : vector<16x128xf32>
    %122 = tpu.matmul %119, %121, %cst_45 {dimension_numbers = #tpu.dot_dimension_numbers<[1], [0], [0], [1], [0, 0, 1, 1], [], []>} : vector<16x128xbf16>, vector<128x128xbf16>, vector<16x128xf32> -> vector<16x128xf32>
    %c9 = arith.constant 9 : index
    %c0_46 = arith.constant 0 : index
    %123 = vector.load %arg2[%c9, %c0_46] : memref<13x128xf32, #tpu.memory_space<vmem>>, vector<1x128xf32>
    %124 = vector.broadcast %123 : vector<1x128xf32> to vector<16x128xf32>
    %125 = arith.addf %122, %124 : vector<16x128xf32>
    %126 = vector.shape_cast %125 : vector<16x128xf32> to vector<2x8x128xf32>
    %cst_47 = arith.constant dense<0.000000e+00> : vector<2x128xf32>
    %127 = vector.multi_reduction <add>, %126, %cst_47 [1] : vector<2x8x128xf32> to vector<2x128xf32>
    %128 = vector.shape_cast %127 : vector<2x128xf32> to vector<2x1x128xf32>
    %cst_48 = arith.constant 8.000000e+00 : f32
    %129 = vector.broadcast %cst_48 : f32 to vector<2x1x128xf32>
    %130 = arith.divf %128, %129 : vector<2x1x128xf32>
    %131 = arith.mulf %126, %126 : vector<2x8x128xf32>
    %cst_49 = arith.constant dense<0.000000e+00> : vector<2x128xf32>
    %132 = vector.multi_reduction <add>, %131, %cst_49 [1] : vector<2x8x128xf32> to vector<2x128xf32>
    %133 = vector.shape_cast %132 : vector<2x128xf32> to vector<2x1x128xf32>
    %cst_50 = arith.constant 8.000000e+00 : f32
    %134 = vector.broadcast %cst_50 : f32 to vector<2x1x128xf32>
    %135 = arith.divf %133, %134 : vector<2x1x128xf32>
    %136 = arith.mulf %130, %130 : vector<2x1x128xf32>
    %137 = arith.subf %135, %136 : vector<2x1x128xf32>
    %cst_51 = arith.constant 0.000000e+00 : f32
    %138 = vector.broadcast %cst_51 : f32 to vector<2x1x128xf32>
    %139 = arith.maximumf %137, %138 : vector<2x1x128xf32>
    %c10 = arith.constant 10 : index
    %c0_52 = arith.constant 0 : index
    %140 = vector.load %arg2[%c10, %c0_52] : memref<13x128xf32, #tpu.memory_space<vmem>>, vector<1x128xf32>
    %cst_53 = arith.constant 9.99999974E-6 : f32
    %141 = vector.broadcast %cst_53 : f32 to vector<2x1x128xf32>
    %142 = arith.addf %139, %141 : vector<2x1x128xf32>
    %143 = math.rsqrt %142 : vector<2x1x128xf32>
    %144 = vector.shape_cast %140 : vector<1x128xf32> to vector<1x1x128xf32>
    %145 = vector.broadcast %144 : vector<1x1x128xf32> to vector<2x1x128xf32>
    %146 = arith.mulf %145, %143 : vector<2x1x128xf32>
    %c11 = arith.constant 11 : index
    %c0_54 = arith.constant 0 : index
    %147 = vector.load %arg2[%c11, %c0_54] : memref<13x128xf32, #tpu.memory_space<vmem>>, vector<1x128xf32>
    %148 = arith.mulf %130, %146 : vector<2x1x128xf32>
    %149 = vector.shape_cast %147 : vector<1x128xf32> to vector<1x1x128xf32>
    %150 = vector.broadcast %149 : vector<1x1x128xf32> to vector<2x1x128xf32>
    %151 = arith.subf %150, %148 : vector<2x1x128xf32>
    %152 = vector.broadcast %146 : vector<2x1x128xf32> to vector<2x8x128xf32>
    %153 = arith.mulf %126, %152 : vector<2x8x128xf32>
    %154 = vector.broadcast %151 : vector<2x1x128xf32> to vector<2x8x128xf32>
    %155 = arith.addf %153, %154 : vector<2x8x128xf32>
    %156 = vector.shape_cast %155 : vector<2x8x128xf32> to vector<16x128xf32>
    %cst_55 = arith.constant 0.000000e+00 : f32
    %157 = vector.broadcast %cst_55 : f32 to vector<16x128xf32>
    %158 = arith.maximumf %156, %157 : vector<16x128xf32>
    %159 = arith.truncf %158 : vector<16x128xf32> to vector<16x128xbf16>
    %c4_56 = arith.constant 4 : index
    %c0_57 = arith.constant 0 : index
    %c0_58 = arith.constant 0 : index
    %160 = vector.load %arg1[%c4_56, %c0_57, %c0_58] : memref<5x128x128xbf16, #tpu.memory_space<vmem>>, vector<1x128x128xbf16>
    %161 = vector.shape_cast %160 : vector<1x128x128xbf16> to vector<128x128xbf16>
    %cst_59 = arith.constant dense<0.000000e+00> : vector<16x128xf32>
    %162 = tpu.matmul %159, %161, %cst_59 {dimension_numbers = #tpu.dot_dimension_numbers<[1], [0], [0], [1], [0, 0, 1, 1], [], []>} : vector<16x128xbf16>, vector<128x128xbf16>, vector<16x128xf32> -> vector<16x128xf32>
    %c12 = arith.constant 12 : index
    %c0_60 = arith.constant 0 : index
    %163 = vector.load %arg2[%c12, %c0_60] : memref<13x128xf32, #tpu.memory_space<vmem>>, vector<1x128xf32>
    %164 = vector.broadcast %163 : vector<1x128xf32> to vector<16x128xf32>
    %165 = arith.addf %162, %164 : vector<16x128xf32>
    %166 = arith.mulf %165, %165 : vector<16x128xf32>
    %cst_61 = arith.constant dense<0.000000e+00> : vector<16xf32>
    %167 = vector.multi_reduction <add>, %166, %cst_61 [1] : vector<16x128xf32> to vector<16xf32>
    %168 = vector.shape_cast %167 : vector<16xf32> to vector<16x1xf32>
    %cst_62 = arith.constant 1.000000e-24 : f32
    %169 = vector.broadcast %cst_62 : f32 to vector<16x1xf32>
    %170 = arith.maximumf %168, %169 : vector<16x1xf32>
    %171 = math.rsqrt %170 : vector<16x1xf32>
    %172 = vector.broadcast %171 : vector<16x1xf32> to vector<16x128xf32>
    %173 = arith.mulf %165, %172 : vector<16x128xf32>
    %174 = arith.mulf %118, %118 : vector<16x128xf32>
    %cst_63 = arith.constant dense<0.000000e+00> : vector<16xf32>
    %175 = vector.multi_reduction <add>, %174, %cst_63 [1] : vector<16x128xf32> to vector<16xf32>
    %176 = vector.shape_cast %175 : vector<16xf32> to vector<16x1xf32>
    %cst_64 = arith.constant 1.000000e-24 : f32
    %177 = vector.broadcast %cst_64 : f32 to vector<16x1xf32>
    %178 = arith.maximumf %176, %177 : vector<16x1xf32>
    %179 = math.rsqrt %178 : vector<16x1xf32>
    %180 = vector.broadcast %179 : vector<16x1xf32> to vector<16x128xf32>
    %181 = arith.mulf %118, %180 : vector<16x128xf32>
    %182 = vector.extract_strided_slice %173 {offsets = [0, 0], sizes = [8, 128], strides = [1, 1]} : vector<16x128xf32> to vector<8x128xf32>
    %183 = vector.extract_strided_slice %181 {offsets = [8, 0], sizes = [8, 128], strides = [1, 1]} : vector<16x128xf32> to vector<8x128xf32>
    %184 = arith.mulf %182, %183 : vector<8x128xf32>
    %cst_65 = arith.constant dense<0.000000e+00> : vector<8xf32>
    %185 = vector.multi_reduction <add>, %184, %cst_65 [1] : vector<8x128xf32> to vector<8xf32>
    %186 = vector.shape_cast %185 : vector<8xf32> to vector<8x1xf32>
    %187 = vector.extract_strided_slice %173 {offsets = [8, 0], sizes = [8, 128], strides = [1, 1]} : vector<16x128xf32> to vector<8x128xf32>
    %188 = vector.extract_strided_slice %181 {offsets = [0, 0], sizes = [8, 128], strides = [1, 1]} : vector<16x128xf32> to vector<8x128xf32>
    %189 = arith.mulf %187, %188 : vector<8x128xf32>
    %cst_66 = arith.constant dense<0.000000e+00> : vector<8xf32>
    %190 = vector.multi_reduction <add>, %189, %cst_66 [1] : vector<8x128xf32> to vector<8xf32>
    %191 = vector.shape_cast %190 : vector<8xf32> to vector<8x1xf32>
    %cst_67 = arith.constant dense<0.000000e+00> : vector<1xf32>
    %192 = vector.multi_reduction <add>, %186, %cst_67 [0] : vector<8x1xf32> to vector<1xf32>
    %193 = vector.shape_cast %192 : vector<1xf32> to vector<1x1xf32>
    %cst_68 = arith.constant 8.000000e+00 : f32
    %194 = vector.broadcast %cst_68 : f32 to vector<1x1xf32>
    %195 = arith.divf %193, %194 : vector<1x1xf32>
    %cst_69 = arith.constant dense<0.000000e+00> : vector<1xf32>
    %196 = vector.multi_reduction <add>, %191, %cst_69 [0] : vector<8x1xf32> to vector<1xf32>
    %197 = vector.shape_cast %196 : vector<1xf32> to vector<1x1xf32>
    %cst_70 = arith.constant 8.000000e+00 : f32
    %198 = vector.broadcast %cst_70 : f32 to vector<1x1xf32>
    %199 = arith.divf %197, %198 : vector<1x1xf32>
    %200 = arith.addf %195, %199 : vector<1x1xf32>
    %cst_71 = arith.constant -5.000000e-01 : f32
    %201 = vector.broadcast %cst_71 : f32 to vector<1x1xf32>
    %202 = arith.mulf %201, %200 : vector<1x1xf32>
    %c0_72 = arith.constant 0 : index
    %c0_73 = arith.constant 0 : index
    %203 = vector.load %arg3[%c0_72, %c0_73] : memref<1x1xf32, #tpu.memory_space<vmem>>, vector<1x1xf32>
    tpu.vector_store %arg3[%c0_72, %c0_73], %202 {strides = array<i32>} : memref<1x1xf32, #tpu.memory_space<vmem>>, vector<1x1xf32>,
    return
  }
}

</mosaic_0001>

<bundles_post_ra>
// kernel: simsiam_loss.1
= control target key start
LH: loop header
LB: loop body
LE: loop exit
PB: predicated region body
PF: predicated region fallthrough
CT: control target
= control target key end

     0   :  { %v1263_v1 = vmov 0.0   ;;  %vm1264_vm0 = vmmov 0   ;;  %s1543_s0 = inlined_call_operand.vmem [shape: f32[16,128], index: 0, kind: input, shape index: {}]   ;;  %s1544_s1 = inlined_call_operand.vmem [shape: bf16[5,128,128], index: 1, kind: input, shape index: {}]   ;;  %s1545_s2 = inlined_call_operand.vmem [shape: f32[13,128], index: 2, kind: input, shape index: {}]   ;;  %s1546_s3 = inlined_call_operand.hbm [shape: f32[1,1], index: 3, kind: output, shape index: {}]  }
   0x1   :  { %v1175_v0 = vld [vmem:[%s1544_s1] sm:$0xff]   ;;  %1072 = vmatprep.subr.bf16.mxu0 %v1263_v1  ;;  %1092 = vmatprep.subr.bf16.mxu1 %v1263_v1  ;;  %v1176_v2 = vld [vmem:[%s1544_s1 + $0x8] sm:$0xff]   ;;  %v1177_v3 = vld [vmem:[%s1544_s1 + $0x10] sm:$0xff]  }
   0x2   :  { %1073 = vmatpush3.bf16.msra.mxu0 %v1175_v0  ;;  %1088 = vmatprep.mubr.msk.bf16.mxu0 %vm1264_vm0, %v1263_v1  ;;  %v1178_v4 = vld [vmem:[%s1544_s1 + $0x18] sm:$0xff]   ;;  %v1179_v5 = vld [vmem:[%s1544_s1 + $0x20] sm:$0xff]   ;;  %v1180_v6 = vld [vmem:[%s1544_s1 + $0x28] sm:$0xff]  }
   0x3   :  { %1074 = vmatprep.subr.bf16.mxu0 %v1263_v1  ;;  %1108 = vmatprep.mubr.msk.bf16.mxu1 %vm1264_vm0, %v1263_v1  ;;  %v1181_v7 = vld [vmem:[%s1544_s1 + $0x30] sm:$0xff]   ;;  %v1182_v8 = vld [vmem:[%s1544_s1 + $0x38] sm:$0xff]   ;;  %v16_v9 = vld [vmem:[%s1543_s0] sm:$0xff] }
   0x4   :  { %v17_v10 = vld [vmem:[%s1543_s0 + $0x8] sm:$0xff] }
   0x5   :  { %v18_v11 = vpack.c.bf16 %v17_v10, %v16_v9 }
   0x6   :  { %1075 = vmatpush3.bf16.msra.mxu0 %v1176_v2 }
   0x7   :  { %1076 = vmatprep.subr.bf16.mxu0 %v1263_v1 }
   0xa   :  { %1077 = vmatpush3.bf16.msra.mxu0 %v1177_v3 }
   0xb   :  { %1078 = vmatprep.subr.bf16.mxu0 %v1263_v1 }
   0xe   :  { %1079 = vmatpush3.bf16.msra.mxu0 %v1178_v4 }
   0xf   :  { %1080 = vmatprep.subr.bf16.mxu0 %v1263_v1 }
  0x12   :  { %1081 = vmatpush3.bf16.msra.mxu0 %v1179_v5 }
  0x13   :  { %1082 = vmatprep.subr.bf16.mxu0 %v1263_v1 }
  0x16   :  { %1083 = vmatpush3.bf16.msra.mxu0 %v1180_v6 }
  0x17   :  { %1084 = vmatprep.subr.bf16.mxu0 %v1263_v1 }
  0x1a   :  { %1085 = vmatpush3.bf16.msra.mxu0 %v1181_v7 }
  0x1b   :  { %1086 = vmatprep.subr.bf16.mxu0 %v1263_v1 }
  0x1e   :  { %1087 = vmatpush3.bf16.msra.mxu0 %v1182_v8 }
  0x1f   :  { %8 = vsyncpa [#allocation3], 0  ;;  %1112 = vmatprep.subr.bf16.mxu0 %v1263_v1  ;;  %v1183_v12 = vld [vmem:[%s1544_s1 + $0x40] sm:$0xff]   ;;  %v1184_v13 = vld [vmem:[%s1544_s1 + $0x48] sm:$0xff]   ;;  %v178_v2 = vlaneseq  ;;  %vm902_vm1 = vcmask 0  }
  0x20   :  { %1093 = vmatpush3.bf16.msra.mxu1 %v1183_v12  ;;  %v1185_v14 = vld [vmem:[%s1544_s1 + $0x50] sm:$0xff]   ;;  %v1186_v15 = vld [vmem:[%s1544_s1 + $0x58] sm:$0xff]   ;;  %v1187_v16 = vld [vmem:[%s1544_s1 + $0x60] sm:$0xff]  }
  0x21   :  { %1089 = vmatmul.mubr.bf16.vlgmr.msra.gmra.mrb[0].mxu0 %v18_v11  ;;  %1094 = vmatprep.subr.bf16.mxu1 %v1263_v1  ;;  %v1188_v17 = vld [vmem:[%s1544_s1 + $0x68] sm:$0xff]   ;;  %v1189_v18 = vld [vmem:[%s1544_s1 + $0x70] sm:$0xff]   ;;  %v1190_v19 = vld [vmem:[%s1544_s1 + $0x78] sm:$0xff]   ;;  %v179_v3 = vshrl.u32 %v178_v2, 7 }
  0x22   :  { %1128 = vmatprep.mubr.msk.bf16.mxu0 %vm1264_vm0, %v1263_v1  ;;  %v918_v20 = vld [vmem:[%s1545_s2] ss:$0 sm:$0xff]  ;;  %v166_v4 = vld [vmem:[%s1545_s2 + $0x1] sm:$0x1]  ;;  %v173_v9 = vld [vmem:[%s1545_s2 + $0x2] sm:$0x1] }
  0x23   :  { %v1370_v5 = vsub.s32 0, %v179_v3 }
  0x24   :  { %1095 = vmatpush3.bf16.msra.mxu1 %v1184_v13 }
  0x25   :  { %1096 = vmatprep.subr.bf16.mxu1 %v1263_v1 }
  0x28   :  { %1097 = vmatpush3.bf16.msra.mxu1 %v1185_v14 }
  0x29   :  { %1098 = vmatprep.subr.bf16.mxu1 %v1263_v1 }
  0x2c   :  { %1099 = vmatpush3.bf16.msra.mxu1 %v1186_v15 }
  0x2d   :  { %1100 = vmatprep.subr.bf16.mxu1 %v1263_v1 }
  0x30   :  { %1101 = vmatpush3.bf16.msra.mxu1 %v1187_v16 }
  0x31   :  { %1102 = vmatprep.subr.bf16.mxu1 %v1263_v1 }
  0x34   :  { %1103 = vmatpush3.bf16.msra.mxu1 %v1188_v17 }
  0x35   :  { %1104 = vmatprep.subr.bf16.mxu1 %v1263_v1 }
  0x38   :  { %1105 = vmatpush3.bf16.msra.mxu1 %v1189_v18 }
  0x39   :  { %1106 = vmatprep.subr.bf16.mxu1 %v1263_v1 }
  0x3c   :  { %1107 = vmatpush3.bf16.msra.mxu1 %v1190_v19 }
  0x3d   :  { %1132 = vmatprep.subr.bf16.mxu1 %v1263_v1 }
  0xf4   :  { %v122_v21 = vpop.f32.mrb[0].mxu0 }
  0xf5   :  { %v123_v22 = vadd.f32 %v918_v20, %v122_v21  ;;  %v1090_v23 = vpop.f32.mrb[1].mxu0 }
  0xf6   :  { %v125_v24 = vpop.f32.mrb[2].mxu0 }
  0xf7   :  { %v129_v25 = vrot.slane %v123_v22, 4  ;;  %v144_v26 = vmul.f32 %v123_v22, %v123_v22  ;;  %v126_v27 = vadd.f32 %v918_v20, %v125_v24  ;;  %v1091_v28 = vpop.f32.mrb[3].mxu0 }
  0xf8   :  { %v1191_v28 = vld [vmem:[%s1544_s1 + $0x80] sm:$0xff]  }
  0xf9   :  { %v130_v29 = vadd.f32 %v129_v25, %v123_v22  ;;  %v146_v30 = vrot.slane %v144_v26, 4  ;;  %v135_v31 = vrot.slane %v126_v27, 4  ;;  %v145_v32 = vmul.f32 %v126_v27, %v126_v27  ;;  %1113 = vmatpush3.bf16.msra.mxu0 %v1191_v28 }
  0xfa   :  { %1114 = vmatprep.subr.bf16.mxu0 %v1263_v1 }
  0xfb   :  { %v131_v33 = vrot.slane %v130_v29, 2  ;;  %v147_v34 = vadd.f32 %v146_v30, %v144_v26  ;;  %v136_v35 = vadd.f32 %v135_v31, %v126_v27  ;;  %v152_v36 = vrot.slane %v145_v32, 4  ;;  %v1195_v30 = vld [vmem:[%s1544_s1 + $0xa0] sm:$0xff]   ;;  %v1196_v31 = vld [vmem:[%s1544_s1 + $0xa8] sm:$0xff]  }
  0xfd   :  { %v132_v37 = vadd.f32 %v131_v33, %v130_v29  ;;  %v148_v38 = vrot.slane %v147_v34, 2  ;;  %v137_v39 = vrot.slane %v136_v35, 2  ;;  %v153_v40 = vadd.f32 %v152_v36, %v145_v32  ;;  %v1194_v29 = vld [vmem:[%s1544_s1 + $0x98] sm:$0xff]   ;;  %v1197_v32 = vld [vmem:[%s1544_s1 + $0xb0] sm:$0xff]  }
  0xfe   :  { %v1198_v33 = vld [vmem:[%s1544_s1 + $0xb8] sm:$0xff]  }
  0xff   :  { %v133_v41 = vrot.slane %v132_v37, 1  ;;  %v149_v42 = vadd.f32 %v148_v38, %v147_v34  ;;  %v138_v43 = vadd.f32 %v137_v39, %v136_v35  ;;  %v154_v44 = vrot.slane %v153_v40, 2  ;;  %v943_v34 = vld [vmem:[%s1545_s2 + $0x3] ss:$0 sm:$0xff] }
 0x101   :  { %v134_v45 = vadd.f32 %v133_v41, %v132_v37  ;;  %v150_v46 = vrot.slane %v149_v42, 1  ;;  %v139_v47 = vrot.slane %v138_v43, 1  ;;  %v155_v48 = vadd.f32 %v154_v44, %v153_v40 }
 0x103   :  { %v142_v49 = vmul.f32 0.125, %v134_v45  ;;  %v151_v50 = vadd.f32 %v150_v46, %v149_v42  ;;  %v140_v51 = vadd.f32 %v139_v47, %v138_v43  ;;  %v156_v52 = vrot.slane %v155_v48, 1 }
 0x105   :  { %v158_v53 = vmul.f32 0.125, %v151_v50  ;;  %v160_v54 = vmul.f32 %v142_v49, %v142_v49  ;;  %v143_v55 = vmul.f32 0.125, %v140_v51  ;;  %v157_v56 = vadd.f32 %v156_v52, %v155_v48 }
 0x107   :  { %v162_v57 = vsub.f32 %v158_v53, %v160_v54  ;;  %v159_v58 = vmul.f32 0.125, %v157_v56  ;;  %v161_v59 = vmul.f32 %v143_v55, %v143_v55 }
 0x109   :  { %v164_v60 = vmax.f32 %v162_v57, 0.0  ;;  %v163_v61 = vsub.f32 %v159_v58, %v161_v59 }
 0x10b   :  { %v167_v62 = vadd.f32 1e-05, %v164_v60  ;;  %v165_v63 = vmax.f32 %v163_v61, 0.0 }
 0x10d   :  { %1215 = vrsqrt.f32 %v167_v62  ;;  %v168_v0 = vadd.f32 1e-05, %v165_v63 }
 0x10f   :  { %1217 = vrsqrt.f32 %v168_v0 }
 0x117   :  { %v1216_v6 = vpop.eup %1215 }
 0x118   :  { %v171_v7 = vmul.f32 %v1216_v6, %v166_v4 }
 0x119   :  { %v1218_v8 = vpop.eup %1217 }
 0x11a   :  { %v172_v10 = vmul.f32 %v1218_v8, %v166_v4  ;;  %v174_v11 = vmul.f32 %v171_v7, %v142_v49  ;;  %v181_v12 = vrot.slane %v171_v7, %v1370_v5 }
 0x11c   :  { %v175_v13 = vmul.f32 %v172_v10, %v143_v55  ;;  %v176_v14 = vsub.f32 %v173_v9, %v174_v11  ;;  %v185_v15 = vrot.slane %v172_v10, %v1370_v5  ;;  %v186_v17 = vmul.f32 %v181_v12, %v123_v22  ;;  %v1192_v22 = vld [vmem:[%s1544_s1 + $0x88] sm:$0xff]  }
 0x11d   :  { %1115 = vmatpush3.bf16.msra.mxu0 %v1192_v22 }
 0x11e   :  { %v177_v16 = vsub.f32 %v173_v9, %v175_v13  ;;  %v191_v18 = vrot.slane %v176_v14, %v1370_v5  ;;  %v187_v19 = vmul.f32 %v185_v15, %v126_v27  ;;  %1116 = vmatprep.subr.bf16.mxu0 %v1263_v1  ;;  %v1193_v27 = vld [vmem:[%s1544_s1 + $0x90] sm:$0xff]  }
 0x120   :  { %v195_v20 = vrot.slane %v177_v16, %v1370_v5  ;;  %v196_v21 = vadd.f32 %v191_v18, %v186_v17  ;;  %v348_v17 = vld [vmem:[%s1545_s2 + $0x4] sm:$0x1] }
 0x121   :  { %1117 = vmatpush3.bf16.msra.mxu0 %v1193_v27 }
 0x122   :  { %v197_v23 = vadd.f32 %v195_v20, %v187_v19  ;;  %v198_v24 = vmax.f32 %v196_v21, 0.0  ;;  %1118 = vmatprep.subr.bf16.mxu0 %v1263_v1  ;;  %v355_v21 = vld [vmem:[%s1545_s2 + $0x5] sm:$0x1] }
 0x124   :  { %v199_v25 = vmax.f32 %v197_v23, 0.0 }
 0x125   :  { %1119 = vmatpush3.bf16.msra.mxu0 %v1194_v29 }
 0x126   :  { %v200_v26 = vpack.c.bf16 %v199_v25, %v198_v24  ;;  %1120 = vmatprep.subr.bf16.mxu0 %v1263_v1 }
 0x128   :  { %1109 = vmatmul.mubr.bf16.vlgmr.msra.gmra.mrb[0].mxu1 %v200_v26 }
 0x129   :  { %1148 = vmatprep.mubr.msk.bf16.mxu1 %vm1264_vm0, %v1263_v1  ;;  %1121 = vmatpush3.bf16.msra.mxu0 %v1195_v30 }
 0x12a   :  { %1122 = vmatprep.subr.bf16.mxu0 %v1263_v1 }
 0x12d   :  { %1123 = vmatpush3.bf16.msra.mxu0 %v1196_v31 }
 0x12e   :  { %1124 = vmatprep.subr.bf16.mxu0 %v1263_v1 }
 0x131   :  { %1125 = vmatpush3.bf16.msra.mxu0 %v1197_v32 }
 0x132   :  { %1126 = vmatprep.subr.bf16.mxu0 %v1263_v1 }
 0x135   :  { %1127 = vmatpush3.bf16.msra.mxu0 %v1198_v33 }
 0x136   :  { %1152 = vmatprep.subr.bf16.mxu0 %v1263_v1 }
 0x1fb   :  { %v305_v35 = vpop.f32.mrb[0].mxu1 }
 0x1fc   :  { %v306_v36 = vadd.f32 %v943_v34, %v305_v35  ;;  %v1110_v37 = vpop.f32.mrb[1].mxu1 }
 0x1fd   :  { %v308_v38 = vpop.f32.mrb[2].mxu1 }
 0x1fe   :  { %v312_v39 = vrot.slane %v306_v36, 4  ;;  %v326_v40 = vmul.f32 %v306_v36, %v306_v36  ;;  %v309_v41 = vadd.f32 %v943_v34, %v308_v38  ;;  %v1111_v42 = vpop.f32.mrb[3].mxu1 }
 0x1ff   :  { %v1203_v42 = vld [vmem:[%s1544_s1 + $0xe0] sm:$0xff]  }
 0x200   :  { %v313_v43 = vadd.f32 %v312_v39, %v306_v36  ;;  %v328_v44 = vrot.slane %v326_v40, 4  ;;  %v318_v45 = vrot.slane %v309_v41, 4  ;;  %v327_v46 = vmul.f32 %v309_v41, %v309_v41  ;;  %v1199_v39 = vld [vmem:[%s1544_s1 + $0xc0] sm:$0xff]  }
 0x201   :  { %1133 = vmatpush3.bf16.msra.mxu1 %v1199_v39 }
 0x202   :  { %v314_v47 = vrot.slane %v313_v43, 2  ;;  %v329_v48 = vadd.f32 %v328_v44, %v326_v40  ;;  %v319_v49 = vadd.f32 %v318_v45, %v309_v41  ;;  %v334_v50 = vrot.slane %v327_v46, 4  ;;  %1134 = vmatprep.subr.bf16.mxu1 %v1263_v1  ;;  %v1201_v40 = vld [vmem:[%s1544_s1 + $0xd0] sm:$0xff]   ;;  %v1206_v45 = vld [vmem:[%s1544_s1 + $0xf8] sm:$0xff]  }
 0x203   :  { %v1205_v44 = vld [vmem:[%s1544_s1 + $0xf0] sm:$0xff]  }
 0x204   :  { %v315_v51 = vadd.f32 %v314_v47, %v313_v43  ;;  %v330_v52 = vrot.slane %v329_v48, 2  ;;  %v320_v53 = vrot.slane %v319_v49, 2  ;;  %v335_v54 = vadd.f32 %v334_v50, %v327_v46  ;;  %v1204_v43 = vld [vmem:[%s1544_s1 + $0xe8] sm:$0xff]   ;;  %v968_v46 = vld [vmem:[%s1545_s2 + $0x6] ss:$0 sm:$0xff] }
 0x206   :  { %v316_v55 = vrot.slane %v315_v51, 1  ;;  %v331_v56 = vadd.f32 %v330_v52, %v329_v48  ;;  %v321_v57 = vadd.f32 %v320_v53, %v319_v49  ;;  %v336_v58 = vrot.slane %v335_v54, 2 }
 0x208   :  { %v317_v59 = vadd.f32 %v316_v55, %v315_v51  ;;  %v332_v60 = vrot.slane %v331_v56, 1  ;;  %v322_v61 = vrot.slane %v321_v57, 1  ;;  %v337_v62 = vadd.f32 %v336_v58, %v335_v54 }
 0x20a   :  { %v324_v63 = vmul.f32 0.125, %v317_v59  ;;  %v333_v0 = vadd.f32 %v332_v60, %v331_v56  ;;  %v323_v2 = vadd.f32 %v322_v61, %v321_v57  ;;  %v338_v3 = vrot.slane %v337_v62, 1 }
 0x20c   :  { %v340_v4 = vmul.f32 0.125, %v333_v0  ;;  %v342_v6 = vmul.f32 %v324_v63, %v324_v63  ;;  %v325_v7 = vmul.f32 0.125, %v323_v2  ;;  %v339_v8 = vadd.f32 %v338_v3, %v337_v62 }
 0x20e   :  { %v344_v9 = vsub.f32 %v340_v4, %v342_v6  ;;  %v341_v10 = vmul.f32 0.125, %v339_v8  ;;  %v343_v11 = vmul.f32 %v325_v7, %v325_v7 }
 0x210   :  { %v346_v12 = vmax.f32 %v344_v9, 0.0  ;;  %v345_v13 = vsub.f32 %v341_v10, %v343_v11 }
 0x212   :  { %v349_v14 = vadd.f32 1e-05, %v346_v12  ;;  %v347_v15 = vmax.f32 %v345_v13, 0.0 }
 0x214   :  { %1219 = vrsqrt.f32 %v349_v14  ;;  %v350_v16 = vadd.f32 1e-05, %v347_v15 }
 0x216   :  { %1221 = vrsqrt.f32 %v350_v16 }
 0x21e   :  { %v1220_v18 = vpop.eup %1219 }
 0x21f   :  { %v353_v19 = vmul.f32 %v1220_v18, %v348_v17 }
 0x220   :  { %v1222_v20 = vpop.eup %1221 }
 0x221   :  { %v356_v23 = vmul.f32 %v353_v19, %v324_v63  ;;  %v363_v24 = vrot.slane %v353_v19, %v1370_v5  ;;  %v354_v25 = vmul.f32 %v1222_v20, %v348_v17 }
 0x223   :  { %v357_v26 = vmul.f32 %v354_v25, %v325_v7  ;;  %v367_v28 = vrot.slane %v354_v25, %v1370_v5  ;;  %v358_v22 = vsub.f32 %v355_v21, %v356_v23  ;;  %v368_v27 = vmul.f32 %v363_v24, %v306_v36  ;;  %v1200_v36 = vld [vmem:[%s1544_s1 + $0xc8] sm:$0xff]  }
 0x224   :  { %1135 = vmatpush3.bf16.msra.mxu1 %v1200_v36 }
 0x225   :  { %v359_v29 = vsub.f32 %v355_v21, %v357_v26  ;;  %v373_v30 = vrot.slane %v358_v22, %v1370_v5  ;;  %v369_v31 = vmul.f32 %v367_v28, %v309_v41  ;;  %1136 = vmatprep.subr.bf16.mxu1 %v1263_v1  ;;  %v1202_v41 = vld [vmem:[%s1544_s1 + $0xd8] sm:$0xff]  }
 0x227   :  { %v377_v32 = vrot.slane %v359_v29, %v1370_v5  ;;  %v378_v33 = vadd.f32 %v373_v30, %v368_v27  ;;  %v530_v29 = vld [vmem:[%s1545_s2 + $0x7] sm:$0x1] }
 0x228   :  { %1137 = vmatpush3.bf16.msra.mxu1 %v1201_v40 }
 0x229   :  { %v379_v34 = vadd.f32 %v377_v32, %v369_v31  ;;  %v380_v35 = vmax.f32 %v378_v33, 0.0  ;;  %1138 = vmatprep.subr.bf16.mxu1 %v1263_v1  ;;  %v537_v33 = vld [vmem:[%s1545_s2 + $0x8] sm:$0x1] }
 0x22b   :  { %v381_v37 = vmax.f32 %v379_v34, 0.0 }
 0x22c   :  { %1139 = vmatpush3.bf16.msra.mxu1 %v1202_v41 }
 0x22d   :  { %v382_v38 = vpack.c.bf16 %v381_v37, %v380_v35  ;;  %1140 = vmatprep.subr.bf16.mxu1 %v1263_v1 }
 0x22f   :  { %1129 = vmatmul.mubr.bf16.vlgmr.msra.gmra.mrb[4].mxu0 %v382_v38 }
 0x230   :  { %1168 = vmatprep.mubr.msk.bf16.mxu0 %vm1264_vm0, %v1263_v1  ;;  %1141 = vmatpush3.bf16.msra.mxu1 %v1203_v42 }
 0x231   :  { %1142 = vmatprep.subr.bf16.mxu1 %v1263_v1 }
 0x234   :  { %1143 = vmatpush3.bf16.msra.mxu1 %v1204_v43 }
 0x235   :  { %1144 = vmatprep.subr.bf16.mxu1 %v1263_v1 }
 0x238   :  { %1145 = vmatpush3.bf16.msra.mxu1 %v1205_v44 }
 0x239   :  { %1146 = vmatprep.subr.bf16.mxu1 %v1263_v1 }
 0x23c   :  { %1147 = vmatpush3.bf16.msra.mxu1 %v1206_v45 }
 0x302   :  { %v487_v47 = vpop.f32.mrb[4].mxu0 }
 0x303   :  { %v488_v48 = vadd.f32 %v968_v46, %v487_v47  ;;  %v1130_v49 = vpop.f32.mrb[5].mxu0 }
 0x304   :  { %v490_v50 = vpop.f32.mrb[6].mxu0 }
 0x305   :  { %v494_v51 = vrot.slane %v488_v48, 4  ;;  %v508_v52 = vmul.f32 %v488_v48, %v488_v48  ;;  %v491_v53 = vadd.f32 %v968_v46, %v490_v50  ;;  %v1131_v54 = vpop.f32.mrb[7].mxu0  ;;  %v1207_v50 = vld [vmem:[%s1544_s1 + $0x100] sm:$0xff]  }
 0x306   :  { %1153 = vmatpush3.bf16.msra.mxu0 %v1207_v50  ;;  %v1211_v54 = vld [vmem:[%s1544_s1 + $0x120] sm:$0xff]  }
 0x307   :  { %v495_v55 = vadd.f32 %v494_v51, %v488_v48  ;;  %v510_v56 = vrot.slane %v508_v52, 4  ;;  %v500_v57 = vrot.slane %v491_v53, 4  ;;  %v509_v58 = vmul.f32 %v491_v53, %v491_v53  ;;  %1154 = vmatprep.subr.bf16.mxu0 %v1263_v1  ;;  %v1208_v51 = vld [vmem:[%s1544_s1 + $0x108] sm:$0xff]  }
 0x309   :  { %v496_v59 = vrot.slane %v495_v55, 2  ;;  %v511_v60 = vadd.f32 %v510_v56, %v508_v52  ;;  %v501_v61 = vadd.f32 %v500_v57, %v491_v53  ;;  %v516_v62 = vrot.slane %v509_v58, 4  ;;  %v1209_v52 = vld [vmem:[%s1544_s1 + $0x110] sm:$0xff]   ;;  %v1214_v57 = vld [vmem:[%s1544_s1 + $0x138] sm:$0xff]  }
 0x30a   :  { %1155 = vmatpush3.bf16.msra.mxu0 %v1208_v51  ;;  %v1213_v56 = vld [vmem:[%s1544_s1 + $0x130] sm:$0xff]  }
 0x30b   :  { %v497_v63 = vadd.f32 %v496_v59, %v495_v55  ;;  %v512_v0 = vrot.slane %v511_v60, 2  ;;  %v502_v2 = vrot.slane %v501_v61, 2  ;;  %v517_v3 = vadd.f32 %v516_v62, %v509_v58  ;;  %1156 = vmatprep.subr.bf16.mxu0 %v1263_v1  ;;  %v1212_v55 = vld [vmem:[%s1544_s1 + $0x128] sm:$0xff]  }
 0x30c   :  { %v993_v58 = vld [vmem:[%s1545_s2 + $0x9] ss:$0 sm:$0xff] }
 0x30d   :  { %v498_v4 = vrot.slane %v497_v63, 1  ;;  %v513_v6 = vadd.f32 %v512_v0, %v511_v60  ;;  %v503_v7 = vadd.f32 %v502_v2, %v501_v61  ;;  %v518_v8 = vrot.slane %v517_v3, 2 }
 0x30e   :  { %1157 = vmatpush3.bf16.msra.mxu0 %v1209_v52 }
 0x30f   :  { %v499_v9 = vadd.f32 %v498_v4, %v497_v63  ;;  %v514_v10 = vrot.slane %v513_v6, 1  ;;  %v504_v11 = vrot.slane %v503_v7, 1  ;;  %v519_v12 = vadd.f32 %v518_v8, %v517_v3  ;;  %1158 = vmatprep.subr.bf16.mxu0 %v1263_v1 }
 0x311   :  { %v515_v13 = vadd.f32 %v514_v10, %v513_v6  ;;  %v505_v14 = vadd.f32 %v504_v11, %v503_v7  ;;  %v520_v15 = vrot.slane %v519_v12, 1  ;;  %v506_v16 = vmul.f32 0.125, %v499_v9 }
 0x313   :  { %v522_v17 = vmul.f32 0.125, %v515_v13  ;;  %v507_v18 = vmul.f32 0.125, %v505_v14  ;;  %v521_v19 = vadd.f32 %v520_v15, %v519_v12  ;;  %v524_v20 = vmul.f32 %v506_v16, %v506_v16 }
 0x315   :  { %v523_v21 = vmul.f32 0.125, %v521_v19  ;;  %v525_v23 = vmul.f32 %v507_v18, %v507_v18  ;;  %v526_v24 = vsub.f32 %v522_v17, %v524_v20 }
 0x317   :  { %v527_v25 = vsub.f32 %v523_v21, %v525_v23  ;;  %v528_v26 = vmax.f32 %v526_v24, 0.0 }
 0x319   :  { %v529_v28 = vmax.f32 %v527_v25, 0.0  ;;  %v531_v22 = vadd.f32 1e-05, %v528_v26 }
 0x31b   :  { %v532_v27 = vadd.f32 1e-05, %v529_v28  ;;  %1223 = vrsqrt.f32 %v531_v22 }
 0x31d   :  { %1225 = vrsqrt.f32 %v532_v27 }
 0x325   :  { %v1224_v30 = vpop.eup %1223 }
 0x326   :  { %v535_v31 = vmul.f32 %v1224_v30, %v530_v29 }
 0x327   :  { %v1226_v32 = vpop.eup %1225 }
 0x328   :  { %v536_v34 = vmul.f32 %v1226_v32, %v530_v29  ;;  %v538_v35 = vmul.f32 %v535_v31, %v506_v16  ;;  %v545_v37 = vrot.slane %v535_v31, %v1370_v5 }
 0x32a   :  { %v549_v38 = vrot.slane %v536_v34, %v1370_v5  ;;  %v540_v39 = vsub.f32 %v537_v33, %v538_v35  ;;  %v539_v36 = vmul.f32 %v536_v34, %v507_v18  ;;  %v550_v40 = vmul.f32 %v545_v37, %v488_v48 }
 0x32c   :  { %v555_v41 = vrot.slane %v540_v39, %v1370_v5  ;;  %v541_v42 = vsub.f32 %v537_v33, %v539_v36  ;;  %v551_v43 = vmul.f32 %v549_v38, %v491_v53  ;;  %v1210_v53 = vld [vmem:[%s1544_s1 + $0x118] sm:$0xff]  }
 0x32d   :  { %1159 = vmatpush3.bf16.msra.mxu0 %v1210_v53 }
 0x32e   :  { %v1471_v44 = vadd.f32 %v555_v41, %v550_v40  ;;  %v559_v45 = vrot.slane %v541_v42, %v1370_v5  ;;  %1160 = vmatprep.subr.bf16.mxu0 %v1263_v1  ;;  %v710_v40 = vld [vmem:[%s1545_s2 + $0xa] sm:$0x1] }
 0x330   :  { %v868_v46 = vmul.f32 %v1471_v44, %v1471_v44  ;;  %v1476_v47 = vadd.f32 %v559_v45, %v551_v43  ;;  %v717_v45 = vld [vmem:[%s1545_s2 + $0xb] sm:$0x1] }
 0x331   :  { %1161 = vmatpush3.bf16.msra.mxu0 %v1211_v54 }
 0x332   :  { %870 = vadd.xlane.f32.xlu1 %v868_v46  ;;  %v562_v49 = vpack.c.bf16 %v1476_v47, %v1471_v44  ;;  %v869_v48 = vmul.f32 %v1476_v47, %v1476_v47  ;;  %1162 = vmatprep.subr.bf16.mxu0 %v1263_v1 }
 0x334   :  { %1149 = vmatmul.mubr.bf16.vlgmr.msra.gmra.mrb[4].mxu1 %v562_v49 }
 0x335   :  { %1163 = vmatpush3.bf16.msra.mxu0 %v1212_v55 }
 0x336   :  { %872 = vadd.xlane.f32.xlu1 %v869_v48  ;;  %1164 = vmatprep.subr.bf16.mxu0 %v1263_v1 }
 0x339   :  { %1165 = vmatpush3.bf16.msra.mxu0 %v1213_v56 }
 0x33a   :  { %1166 = vmatprep.subr.bf16.mxu0 %v1263_v1 }
 0x33d   :  { %1167 = vmatpush3.bf16.msra.mxu0 %v1214_v57 }
 0x407   :  { %v667_v59 = vpop.f32.mrb[4].mxu1 }
 0x408   :  { %v668_v60 = vadd.f32 %v993_v58, %v667_v59  ;;  %v1150_v61 = vpop.f32.mrb[5].mxu1 }
 0x409   :  { %v670_v62 = vpop.f32.mrb[6].mxu1 }
 0x40a   :  { %v674_v63 = vrot.slane %v668_v60, 4  ;;  %v688_v0 = vmul.f32 %v668_v60, %v668_v60  ;;  %v671_v2 = vadd.f32 %v993_v58, %v670_v62  ;;  %v1151_v3 = vpop.f32.mrb[7].mxu1 }
 0x40c   :  { %v675_v4 = vadd.f32 %v674_v63, %v668_v60  ;;  %v690_v6 = vrot.slane %v688_v0, 4  ;;  %v680_v7 = vrot.slane %v671_v2, 4  ;;  %v689_v8 = vmul.f32 %v671_v2, %v671_v2 }
 0x40e   :  { %v676_v9 = vrot.slane %v675_v4, 2  ;;  %v691_v10 = vadd.f32 %v690_v6, %v688_v0  ;;  %v681_v1 = vadd.f32 %v680_v7, %v671_v2  ;;  %v696_v11 = vrot.slane %v689_v8, 4  ;;  %v1018_v0 = vld [vmem:[%s1545_s2 + $0xc] ss:$0 sm:$0xff]  ;;  %s1265_s2 = smov [#allocation2]  }
 0x40f   :  { %s910_s9 = sshll.u32 %s1265_s2, 4  ;;  %s911_s9 = int_to_ptr.vmem [resolvable:$true] %s910_s9 }
 0x410   :  { %v677_v12 = vadd.f32 %v676_v9, %v675_v4  ;;  %v692_v13 = vrot.slane %v691_v10, 2  ;;  %v682_v14 = vrot.slane %v681_v1, 2  ;;  %v697_v15 = vadd.f32 %v696_v11, %v689_v8  ;;  %s1239_s10 = scalar_lea.vmem %s911_s9, 16  ;;  %s1243_s11 = scalar_lea.vmem %s911_s9, 32 }
 0x411   :  { %p1240_p0 = scmp.ne.s32.totalorder %s911_s9, %s1239_s10  ;;  %p1244_p1 = scmp.lt.s32.totalorder %s911_s9, %s911_s9 }
 0x412   :  { %v678_v16 = vrot.slane %v677_v12, 1  ;;  %v693_v17 = vadd.f32 %v692_v13, %v691_v10  ;;  %v683_v18 = vadd.f32 %v682_v14, %v681_v1  ;;  %v698_v19 = vrot.slane %v697_v15, 2  ;;  %p1245_p2 = scmp.lt.s32.totalorder %s1243_s11, %s1239_s10 }
 0x414   :  { %v679_v20 = vadd.f32 %v678_v16, %v677_v12  ;;  %v694_v21 = vrot.slane %v693_v17, 1  ;;  %v684_v23 = vrot.slane %v683_v18, 1  ;;  %v699_v24 = vadd.f32 %v698_v19, %v697_v15  ;;  %p1246_p3 = por %p1245_p2, %p1244_p1 }
 0x416   :  { %v686_v25 = vmul.f32 0.125, %v679_v20  ;;  %v695_v26 = vadd.f32 %v694_v21, %v693_v17  ;;  %v685_v28 = vadd.f32 %v684_v23, %v683_v18  ;;  %v700_v22 = vrot.slane %v699_v24, 1  ;;  %p1247_p4 = pnand %p1246_p3, %p1240_p0 }
 0x418   :  { %v702_v27 = vmul.f32 0.125, %v695_v26  ;;  %v704_v29 = vmul.f32 %v686_v25, %v686_v25  ;;  %v687_v30 = vmul.f32 0.125, %v685_v28  ;;  %v701_v31 = vadd.f32 %v700_v22, %v699_v24 }
 0x41a   :  { %v706_v32 = vsub.f32 %v702_v27, %v704_v29  ;;  %v703_v33 = vmul.f32 0.125, %v701_v31  ;;  %v705_v34 = vmul.f32 %v687_v30, %v687_v30 }
 0x41c   :  { %v708_v35 = vmax.f32 %v706_v32, 0.0  ;;  %v707_v37 = vsub.f32 %v703_v33, %v705_v34 }
 0x41e   :  { %v711_v38 = vadd.f32 1e-05, %v708_v35  ;;  %v709_v39 = vmax.f32 %v707_v37, 0.0 }
 0x420   :  { %1227 = vrsqrt.f32 %v711_v38  ;;  %v712_v36 = vadd.f32 1e-05, %v709_v39 }
 0x422   :  { %1229 = vrsqrt.f32 %v712_v36 }
 0x42a   :  { %v1228_v41 = vpop.eup %1227 }
 0x42b   :  { %v715_v42 = vmul.f32 %v1228_v41, %v710_v40 }
 0x42c   :  { %v1230_v43 = vpop.eup %1229 }
 0x42d   :  { %v718_v46 = vmul.f32 %v715_v42, %v686_v25  ;;  %v725_v49 = vrot.slane %v715_v42, %v1370_v5  ;;  %v716_v48 = vmul.f32 %v1230_v43, %v710_v40 }
 0x42f   :  { %v719_v50 = vmul.f32 %v716_v48, %v687_v30  ;;  %v729_v51 = vrot.slane %v716_v48, %v1370_v5  ;;  %v720_v52 = vsub.f32 %v717_v45, %v718_v46  ;;  %v730_v53 = vmul.f32 %v725_v49, %v668_v60 }
 0x431   :  { %v721_v54 = vsub.f32 %v717_v45, %v719_v50  ;;  %v735_v55 = vrot.slane %v720_v52, %v1370_v5  ;;  %v731_v56 = vmul.f32 %v729_v51, %v671_v2 }
 0x433   :  { %v739_v57 = vrot.slane %v721_v54, %v1370_v5  ;;  %v740_v58 = vadd.f32 %v735_v55, %v730_v53  ;;  %v871_v5 = vpop.xlane.xlu1 %870 }
 0x434   :  { %v874_v12 = vmax.f32 %v871_v5, 1e-24 }
 0x435   :  { %v741_v59 = vadd.f32 %v739_v57, %v731_v56  ;;  %v742_v61 = vmax.f32 %v740_v58, 0.0 }
 0x437   :  { %v743_v62 = vmax.f32 %v741_v59, 0.0  ;;  %v873_v10 = vpop.xlane.xlu1 %872 }
 0x438   :  { %v875_v1 = vmax.f32 %v873_v10, 1e-24 }
 0x439   :  { %v744_v63 = vpack.c.bf16 %v743_v62, %v742_v61 }
 0x43a   :  { %1231 = vrsqrt.f32 %v875_v1 }
 0x43b   :  { %1169 = vmatmul.mubr.bf16.vlgmr.msra.gmra.mrb[8].mxu0 %v744_v63 }
 0x444   :  { %v1232_v16 = vpop.eup %1231 }
 0x445   :  { %v879_v19 = vmul.f32 %v1232_v16, %v1476_v47 }
 0x50e   :  { %v849_v3 = vpop.f32.mrb[8].mxu0 }
 0x50f   :  { %v850_v4 = vadd.f32 %v1018_v0, %v849_v3  ;;  %v1170_v6 = vpop.f32.mrb[9].mxu0 }
 0x510   :  { %v852_v60 = vpop.f32.mrb[10].mxu0 }
 0x511   :  { %v853_v7 = vadd.f32 %v1018_v0, %v852_v60  ;;  %v1171_v8 = vpop.f32.mrb[11].mxu0  ;;  %v856_v9 = vmul.f32 %v850_v4, %v850_v4 }
 0x513   :  { %858 = vadd.xlane.f32.xlu0 %v856_v9  ;;  %v857_v2 = vmul.f32 %v853_v7, %v853_v7 }
 0x517   :  { %860 = vadd.xlane.f32.xlu0 %v857_v2 }
 0x5a0   :  { %v859_v11 = vpop.xlane.xlu0 %858 }
 0x5a1   :  { %v862_v13 = vmax.f32 %v859_v11, 1e-24 }
 0x5a3   :  { %1233 = vrsqrt.f32 %v862_v13 }
 0x5a4   :  { %v861_v14 = vpop.xlane.xlu0 %860  ;;  %1235 = vrsqrt.f32 %v874_v12 }
 0x5a5   :  { %v863_v15 = vmax.f32 %v861_v14, 1e-24 }
 0x5a7   :  { %1237 = vrsqrt.f32 %v863_v15 }
 0x5ad   :  { %v1234_v17 = vpop.eup %1233 }
 0x5ae   :  { %v866_v18 = vmul.f32 %v1234_v17, %v850_v4  ;;  %v1236_v20 = vpop.eup %1235 }
 0x5af   :  { %v878_v25 = vmul.f32 %v1236_v20, %v1471_v44 }
 0x5b0   :  { %v880_v21 = vmul.f32 %v879_v19, %v866_v18 }
 0x5b1   :  { %v1238_v23 = vpop.eup %1237 }
 0x5b2   :  { %881 = vadd.xlane.f32.xlu0 %v880_v21  ;;  %v867_v24 = vmul.f32 %v1238_v23, %v853_v7 }
 0x5b4   :  { %v883_v26 = vmul.f32 %v878_v25, %v867_v24 }
 0x5b6   :  { %884 = vadd.xlane.f32.xlu1 %v883_v26 }
 0x63f   :  { %v882_v28 = vpop.xlane.xlu0 %881 }
 0x640   :  { %v886_v22 = vrot.slane %v882_v28, 4 }
 0x642   :  { %v887_v27 = vadd.f32 %v886_v22, %v882_v28 }
 0x643   :  { %v885_v29 = vpop.xlane.xlu1 %884 }
 0x644   :  { %v888_v30 = vrot.slane %v887_v27, 2  ;;  %v893_v31 = vrot.slane %v885_v29, 4 }
 0x646   :  { %v889_v32 = vadd.f32 %v888_v30, %v887_v27  ;;  %v894_v33 = vadd.f32 %v893_v31, %v885_v29 }
 0x648   :  { %v890_v34 = vrot.slane %v889_v32, 1  ;;  %v895_v35 = vrot.slane %v894_v33, 2 }
 0x64a   :  { %v896_v47 = vadd.f32 %v895_v35, %v894_v33  ;;  %v891_v37 = vadd.f32 %v890_v34, %v889_v32 }
 0x64c   :  { %v897_v38 = vrot.slane %v896_v47, 1  ;;  %v892_v36 = vmul.f32 0.125, %v891_v37 }
 0x64e   :  { %v898_v39 = vadd.f32 %v897_v38, %v896_v47 }
 0x650   :  { %v899_v40 = vmul.f32 0.125, %v898_v39 }
 0x652   :  { %v900_v44 = vadd.f32 %v899_v40, %v892_v36 }
 0x654   :  { %v901_v41 = vmul.f32 -0.5, %v900_v44 }
 0x656   :  { %903 = vst.msk [vmem:[#allocation2] sm:$0x1] %vm902_vm1, %v901_v41 }
 0x657   :  { %1250 = shalt.err (!%p1247_p4)
}
 0x658   :  { %s1251_s14 = scalar_lea.hbm %s1546_s3, 16 }
 0x659   :  { %p1252_p5 = scmp.ne.s32.totalorder %s1546_s3, %s1251_s14  ;;  %p1255_p6 = scmp.lt.u32.totalorder %s1251_s14, %s1546_s3 }
 0x65b   :  { %p1257_p7 = pnand %p1255_p6, %p1252_p5 }
 0x65d   :  { %1260 = shalt.err (!%p1257_p7)
}
 0x65e   :  { %913 = dma.vmem_to_hbm [thread:$0]  %s911_s9, 16, %s1546_s3, [#allocation3]  }
 0x65f   :  { %1261 = dma.done.wait [#allocation3], 16  }
 0x660   :  { %1262 = vsyncadd [#allocation3], 4294967280 }
 0x661   :  { %917 = vsyncpa [#allocation3], 1 }

</bundles_post_ra>
